<compile_context>
chip_gen: v5e
topology: v5e:2x2
jax: 0.10.0
libtpu: 0.0.40
codegen_flags: <defaults>
</compile_context>

<pallas_src>
import jax
import jax.numpy as jnp
from jax.experimental import pallas as pl
from jax.experimental.pallas import tpu as pltpu

LN_EPS = 1e-6  # eps is added to sigma (std), matching spinn's LayerNormalization


# ----------------------------------------------------------------------------
# Kernel: one grid step == one Tracker.forward() call, state carried in scratch.
# ----------------------------------------------------------------------------
def tracker_kernel(xs_ref, ln_ref, w_ref, b_ref, hc0_ref, hc_out_ref, hc_scr):
    t = pl.program_id(0)

    # First step: load the initial (h, c).  hc0 = zeros reproduces the
    # self.h is None / self.c is None path of the PyTorch module exactly
    # (lateral Linear has no bias, so lateral(0) == 0).
    @pl.when(t == 0)
    def _():
        hc_scr[...] = hc0_ref[...]

    b, hc2 = hc_scr.shape
    tr = hc2 // 2
    s = xs_ref.shape[-1]
    k_pad = w_ref.shape[0]

    # ---- single fused LayerNorm over stacked [buf; stack1; stack2] rows -----
    z = xs_ref[...]                                   # (3B, S) f32
    mu = jnp.mean(z, axis=-1, keepdims=True)
    d = z - mu
    var = jnp.sum(d * d, axis=-1, keepdims=True) * (1.0 / (s - 1))  # unbiased
    inv_sigma = pl.reciprocal(jnp.sqrt(var) + LN_EPS, approx=True)
    zn = d * inv_sigma * ln_ref[0] + ln_ref[1]        # (3B, S)

    h_prev = hc_scr[:, 0:tr]
    c_prev = hc_scr[:, tr:hc2]

    # ---- one fused projection on the MXU (K padded to 128, bf16 operands) ---
    pad = k_pad - 3 * s - tr
    pieces = [zn[0:b], zn[b:2 * b], zn[2 * b:3 * b], h_prev]
    if pad > 0:
        pieces.append(jnp.zeros((b, pad), jnp.float32))
    x_cat = jnp.concatenate(pieces, axis=1).astype(jnp.bfloat16)   # (B, Kpad)

    gates = jnp.dot(x_cat, w_ref[...], preferred_element_type=jnp.float32)
    gates = gates + b_ref[...]                        # (B, 4*tr) f32

    # ---- lstm(c_prev, tracker_inp), gate math in f32 -------------------------
    a = gates[:, 0 * tr:1 * tr]
    i = gates[:, 1 * tr:2 * tr]
    f = gates[:, 2 * tr:3 * tr]
    o = gates[:, 3 * tr:4 * tr]

    c = jnp.tanh(a) * jax.nn.sigmoid(i) + jax.nn.sigmoid(f) * c_prev
    h = jax.nn.sigmoid(o) * jnp.tanh(c)

    hc = jnp.concatenate([h, c], axis=1)              # (B, 2*tr) = [h | c]
    hc_scr[...] = hc
    hc_out_ref[...] = hc


# ----------------------------------------------------------------------------
# Wrapper: T consecutive Tracker.forward() calls in a single pallas_call.
# ----------------------------------------------------------------------------
@jax.jit
def tracker_run(x_seq, hc0, ln_gb, w_cat, bias):
    """x_seq[t] = concat([top_buf_t, top_stack_1_t, top_stack_2_t], axis=0)
       -> shape (T, 3*batch, size).  hc0 = [h0 | c0] (zeros for a fresh state).
       Returns (T, batch, 2*tracker) with hc[t] = [h_t | c_t]."""
    T, three_b, size = x_seq.shape
    batch, hc2 = hc0.shape
    k_pad, gdim = w_cat.shape

    grid_spec = pltpu.PrefetchScalarGridSpec(
        num_scalar_prefetch=0,
        grid=(T,),
        in_specs=[
            pl.BlockSpec((None, three_b, size), lambda t: (t, 0, 0)),  # x_seq
            pl.BlockSpec((2, three_b, size), lambda t: (0, 0, 0)),     # ln g/b
            pl.BlockSpec((k_pad, gdim), lambda t: (0, 0)),             # W_cat
            pl.BlockSpec((1, gdim), lambda t: (0, 0)),                 # bias
            pl.BlockSpec((batch, hc2), lambda t: (0, 0)),              # hc0
        ],
        out_specs=pl.BlockSpec((None, batch, hc2), lambda t: (t, 0, 0)),
        scratch_shapes=[pltpu.VMEM((batch, hc2), jnp.float32)],
    )
    return pl.pallas_call(
        tracker_kernel,
        out_shape=jax.ShapeDtypeStruct((T, batch, hc2), jnp.float32),
        grid_spec=grid_spec,
        compiler_params=pltpu.CompilerParams(
            dimension_semantics=("arbitrary",)),  # recurrence over steps
    )(x_seq, ln_gb, w_cat, bias, hc0)
    # TODO(synk): for very large batch on v7x, add a "parallel" batch grid axis
    # so the second TensorCore is used; at batch=8 a single core is correct.


# ----------------------------------------------------------------------------
# Parameter construction / host-side preprocessing.
# ----------------------------------------------------------------------------
def init_tracker_params(key, size, tracker_size):
    """Deterministic synthetic init mirroring the module's parameter shapes."""
    k_buf, k_s1, k_s2, k_lat = jax.random.split(key, 4)
    out = 4 * tracker_size
    scale_in = 1.0 / jnp.sqrt(jnp.float32(size))
    scale_lat = jnp.sqrt(2.0 / jnp.float32(tracker_size))  # kaiming_normal-ish
    return {
        "ln_gamma": jnp.ones((3, size), jnp.float32),   # a2 = ones
        "ln_beta": jnp.zeros((3, size), jnp.float32),   # b2 = zeros
        # Linear weights stored as (in_features, out_features)
        "w_buf": jax.random.normal(k_buf, (size, out), jnp.float32) * scale_in,
        "b_buf": jnp.zeros((1, out), jnp.float32),
        "w_stack1": jax.random.normal(k_s1, (size, out), jnp.float32) * scale_in,
        "w_stack2": jax.random.normal(k_s2, (size, out), jnp.float32) * scale_in,
        "w_lateral": jax.random.normal(k_lat, (tracker_size, out), jnp.float32)
                     * scale_lat,
    }


def prepare_params(params, batch):
    """One-time preprocessing: fuse weights (K padded to a 128 multiple, bf16)
    and pre-broadcast the LN scale/shift to the stacked-row layout."""
    size = params["w_buf"].shape[0]
    tracker = params["w_lateral"].shape[0]
    out = params["w_buf"].shape[1]
    k = 3 * size + tracker
    k_pad = ((k + 127) // 128) * 128

    w_cat = jnp.concatenate(
        [params["w_buf"], params["w_stack1"], params["w_stack2"],
         params["w_lateral"]], axis=0)                       # (3S+TR, 4*TR)
    w_cat = jnp.pad(w_cat, ((0, k_pad - k), (0, 0)))         # (Kpad, 4*TR)

    gamma_b = jnp.repeat(params["ln_gamma"], batch, axis=0)  # (3B, S)
    beta_b = jnp.repeat(params["ln_beta"], batch, axis=0)    # (3B, S)
    return {
        "w_cat": w_cat.astype(jnp.bfloat16),
        "bias": params["b_buf"].reshape(1, out).astype(jnp.float32),
        "ln": jnp.stack([gamma_b, beta_b]).astype(jnp.float32),  # (2, 3B, S)
    }


# ----------------------------------------------------------------------------
# Pure-JAX f32 reference (mirrors the PyTorch module) for validation.
# ----------------------------------------------------------------------------
def tracker_reference(x_seq, hc0, params, tracker_size):
    T, three_b, size = x_seq.shape
    b = three_b // 3

    def ln(z, g, bt):
        mu = jnp.mean(z, axis=-1, keepdims=True)
        var = jnp.sum((z - mu) ** 2, axis=-1, keepdims=True) / (size - 1)
        return (z - mu) / (jnp.sqrt(var) + LN_EPS) * g + bt

    h = hc0[:, :tracker_size]
    c = hc0[:, tracker_size:]
    outs = []
    for t in range(T):
        buf = ln(x_seq[t, 0:b], params["ln_gamma"][0], params["ln_beta"][0])
        s1 = ln(x_seq[t, b:2 * b], params["ln_gamma"][1], params["ln_beta"][1])
        s2 = ln(x_seq[t, 2 * b:3 * b], params["ln_gamma"][2], params["ln_beta"][2])
        inp = (buf @ params["w_buf"] + params["b_buf"]
               + s1 @ params["w_stack1"] + s2 @ params["w_stack2"]
               + h @ params["w_lateral"])
        a, i, f, o = jnp.split(inp, 4, axis=1)
        c = jnp.tanh(a) * jax.nn.sigmoid(i) + jax.nn.sigmoid(f) * c
        h = jax.nn.sigmoid(o) * jnp.tanh(c)
        outs.append(jnp.concatenate([h, c], axis=1))
    return jnp.stack(outs)


if __name__ == "__main__":
    BATCH = 8      # batch size
    SIZE = 32      # parser hidden state dim (FLAGS.model_dim)
    TRACKER = 16   # FLAGS.tracking_lstm_hidden_dim
    T = 4          # number of Tracker.forward() steps fused into one pallas_call

    key = jax.random.PRNGKey(0)
    k_p, k_x = jax.random.split(key)

    params = init_tracker_params(k_p, SIZE, TRACKER)
    prep = prepare_params(params, BATCH)

    # x_seq[t] = concat([top_buf_t, top_stack_1_t, top_stack_2_t], axis=0)
    x_seq = jax.random.normal(k_x, (T, 3 * BATCH, SIZE), jnp.float32)
    # Fresh tracker state (self.h is None / self.c is None)  <=>  hc0 = 0.
    hc0 = jnp.zeros((BATCH, 2 * TRACKER), jnp.float32)

    hc_seq = tracker_run(x_seq, hc0, prep["ln"], prep["w_cat"], prep["bias"])
    hc_seq = jax.block_until_ready(hc_seq)
    h_seq, c_seq = hc_seq[..., :TRACKER], hc_seq[..., TRACKER:]

    ref = tracker_reference(x_seq, hc0, params, TRACKER)
    err = float(jnp.max(jnp.abs(hc_seq - ref)))

    assert hc_seq.shape == (T, BATCH, 2 * TRACKER)
    assert h_seq.shape == (T, BATCH, TRACKER) and c_seq.shape == (T, BATCH, TRACKER)
    assert bool(jnp.all(jnp.isfinite(hc_seq)))
    # Relaxed tolerance: projection uses bf16 MXU operands + approx reciprocal.
    assert err < 0.1, f"mismatch vs f32 reference: {err}"
    print("KERNEL_OK")
</pallas_src>

<mosaic_0001>
module attributes {stable_mosaic.version = 11 : i64} {
  func.func @tracker_kernel(%arg0: i32, %arg1: memref<1x24x32xf32, #tpu.memory_space<vmem>>, %arg2: memref<2x24x32xf32, #tpu.memory_space<vmem>>, %arg3: memref<128x64xbf16, #tpu.memory_space<vmem>>, %arg4: memref<1x64xf32, #tpu.memory_space<vmem>>, %arg5: memref<8x32xf32, #tpu.memory_space<vmem>>, %arg6: memref<1x8x32xf32, #tpu.memory_space<vmem>>, %arg7: memref<8x32xf32, #tpu.memory_space<vmem>>) attributes {dimension_semantics = [#tpu.dimension_semantics<arbitrary>], iteration_bounds = array<i64: 4>, scalar_prefetch = 0 : i64, scratch_operands = 1 : i64, tpu.core_type = #tpu.core_type<tc>, window_params = [{transform_indices = @transform_0, window_bounds = array<i64: 1, 24, 32>}, {pipeline_mode = #tpu.pipeline_mode<synchronous>, transform_indices = @transform_1, window_bounds = array<i64: 2, 24, 32>}, {pipeline_mode = #tpu.pipeline_mode<synchronous>, transform_indices = @transform_2, window_bounds = array<i64: 128, 64>}, {pipeline_mode = #tpu.pipeline_mode<synchronous>, transform_indices = @transform_3, window_bounds = array<i64: 1, 64>}, {pipeline_mode = #tpu.pipeline_mode<synchronous>, transform_indices = @transform_4, window_bounds = array<i64: 8, 32>}, {transform_indices = @transform_5, window_bounds = array<i64: 1, 8, 32>}]} {
    %c0_i32 = arith.constant 0 : i32
    %0 = arith.cmpi eq, %arg0, %c0_i32 : i32
    %1 = arith.extui %0 : i1 to i32
    %c0_i32_0 = arith.constant 0 : i32
    %2 = arith.cmpi ne, %1, %c0_i32_0 : i32
    scf.if %2 {
      %c0_29 = arith.constant 0 : index
      %c0_30 = arith.constant 0 : index
      %71 = vector.load %arg5[%c0_29, %c0_30] : memref<8x32xf32, #tpu.memory_space<vmem>>, vector<8x32xf32>
      %c0_31 = arith.constant 0 : index
      %c0_32 = arith.constant 0 : index
      %72 = vector.load %arg7[%c0_31, %c0_32] : memref<8x32xf32, #tpu.memory_space<vmem>>, vector<8x32xf32>
      tpu.vector_store %arg7[%c0_31, %c0_32], %71 {strides = array<i32>} : memref<8x32xf32, #tpu.memory_space<vmem>>, vector<8x32xf32>,
    } else {
    }
    %c0 = arith.constant 0 : index
    %c0_1 = arith.constant 0 : index
    %c0_2 = arith.constant 0 : index
    %3 = vector.load %arg1[%c0, %c0_1, %c0_2] : memref<1x24x32xf32, #tpu.memory_space<vmem>>, vector<1x24x32xf32>
    %4 = vector.shape_cast %3 : vector<1x24x32xf32> to vector<24x32xf32>
    %cst = arith.constant dense<0.000000e+00> : vector<24xf32>
    %5 = vector.multi_reduction <add>, %4, %cst [1] : vector<24x32xf32> to vector<24xf32>
    %6 = vector.shape_cast %5 : vector<24xf32> to vector<24x1xf32>
    %cst_3 = arith.constant 3.200000e+01 : f32
    %7 = vector.broadcast %cst_3 : f32 to vector<24x1xf32>
    %8 = arith.divf %6, %7 : vector<24x1xf32>
    %9 = vector.broadcast %8 : vector<24x1xf32> to vector<24x32xf32>
    %10 = arith.subf %4, %9 : vector<24x32xf32>
    %11 = arith.mulf %10, %10 : vector<24x32xf32>
    %cst_4 = arith.constant dense<0.000000e+00> : vector<24xf32>
    %12 = vector.multi_reduction <add>, %11, %cst_4 [1] : vector<24x32xf32> to vector<24xf32>
    %13 = vector.shape_cast %12 : vector<24xf32> to vector<24x1xf32>
    %cst_5 = arith.constant 0.0322580636 : f32
    %14 = vector.broadcast %cst_5 : f32 to vector<24x1xf32>
    %15 = arith.mulf %13, %14 : vector<24x1xf32>
    %16 = math.sqrt %15 : vector<24x1xf32>
    %cst_6 = arith.constant 9.99999997E-7 : f32
    %17 = vector.broadcast %cst_6 : f32 to vector<24x1xf32>
    %18 = arith.addf %16, %17 : vector<24x1xf32>
    %19 = tpu.reciprocal %18 {approx = true} : vector<24x1xf32> -> vector<24x1xf32>
    %20 = vector.broadcast %19 : vector<24x1xf32> to vector<24x32xf32>
    %21 = arith.mulf %10, %20 : vector<24x32xf32>
    %c0_7 = arith.constant 0 : index
    %c0_8 = arith.constant 0 : index
    %c0_9 = arith.constant 0 : index
    %22 = vector.load %arg2[%c0_7, %c0_8, %c0_9] : memref<2x24x32xf32, #tpu.memory_space<vmem>>, vector<1x24x32xf32>
    %23 = vector.shape_cast %22 : vector<1x24x32xf32> to vector<24x32xf32>
    %24 = arith.mulf %21, %23 : vector<24x32xf32>
    %c1 = arith.constant 1 : index
    %c0_10 = arith.constant 0 : index
    %c0_11 = arith.constant 0 : index
    %25 = vector.load %arg2[%c1, %c0_10, %c0_11] : memref<2x24x32xf32, #tpu.memory_space<vmem>>, vector<1x24x32xf32>
    %26 = vector.shape_cast %25 : vector<1x24x32xf32> to vector<24x32xf32>
    %27 = arith.addf %24, %26 : vector<24x32xf32>
    %c0_12 = arith.constant 0 : index
    %c0_13 = arith.constant 0 : index
    %28 = vector.load %arg7[%c0_12, %c0_13] : memref<8x32xf32, #tpu.memory_space<vmem>>, vector<8x16xf32>
    %c0_14 = arith.constant 0 : index
    %c16 = arith.constant 16 : index
    %29 = vector.load %arg7[%c0_14, %c16] : memref<8x32xf32, #tpu.memory_space<vmem>>, vector<8x16xf32>
    %30 = vector.extract_strided_slice %27 {offsets = [0, 0], sizes = [8, 32], strides = [1, 1]} : vector<24x32xf32> to vector<8x32xf32>
    %31 = vector.extract_strided_slice %27 {offsets = [8, 0], sizes = [8, 32], strides = [1, 1]} : vector<24x32xf32> to vector<8x32xf32>
    %32 = vector.extract_strided_slice %27 {offsets = [16, 0], sizes = [8, 32], strides = [1, 1]} : vector<24x32xf32> to vector<8x32xf32>
    %cst_15 = arith.constant 0.000000e+00 : f32
    %33 = vector.broadcast %cst_15 : f32 to vector<8x16xf32>
    %34 = tpu.concatenate %30, %31, %32, %28, %33 in 1 : vector<8x32xf32>, vector<8x32xf32>, vector<8x32xf32>, vector<8x16xf32>, vector<8x16xf32> -> vector<8x128xf32>
    %35 = arith.truncf %34 : vector<8x128xf32> to vector<8x128xbf16>
    %c0_16 = arith.constant 0 : index
    %c0_17 = arith.constant 0 : index
    %36 = vector.load %arg3[%c0_16, %c0_17] : memref<128x64xbf16, #tpu.memory_space<vmem>>, vector<128x64xbf16>
    %cst_18 = arith.constant dense<0.000000e+00> : vector<8x64xf32>
    %37 = tpu.matmul %35, %36, %cst_18 {dimension_numbers = #tpu.dot_dimension_numbers<[1], [0], [0], [1], [0, 0, 1, 1], [], []>} : vector<8x128xbf16>, vector<128x64xbf16>, vector<8x64xf32> -> vector<8x64xf32>
    %c0_19 = arith.constant 0 : index
    %c0_20 = arith.constant 0 : index
    %38 = vector.load %arg4[%c0_19, %c0_20] : memref<1x64xf32, #tpu.memory_space<vmem>>, vector<1x64xf32>
    %39 = vector.broadcast %38 : vector<1x64xf32> to vector<8x64xf32>
    %40 = arith.addf %37, %39 : vector<8x64xf32>
    %41 = vector.extract_strided_slice %40 {offsets = [0, 0], sizes = [8, 16], strides = [1, 1]} : vector<8x64xf32> to vector<8x16xf32>
    %42 = vector.extract_strided_slice %40 {offsets = [0, 16], sizes = [8, 16], strides = [1, 1]} : vector<8x64xf32> to vector<8x16xf32>
    %43 = vector.extract_strided_slice %40 {offsets = [0, 32], sizes = [8, 16], strides = [1, 1]} : vector<8x64xf32> to vector<8x16xf32>
    %44 = vector.extract_strided_slice %40 {offsets = [0, 48], sizes = [8, 16], strides = [1, 1]} : vector<8x64xf32> to vector<8x16xf32>
    %45 = math.tanh %41 : vector<8x16xf32>
    %46 = arith.negf %42 : vector<8x16xf32>
    %47 = math.exp %46 : vector<8x16xf32>
    %cst_21 = arith.constant 1.000000e+00 : f32
    %48 = vector.broadcast %cst_21 : f32 to vector<8x16xf32>
    %49 = arith.addf %48, %47 : vector<8x16xf32>
    %50 = arith.divf %48, %49 : vector<8x16xf32>
    %51 = arith.mulf %45, %50 : vector<8x16xf32>
    %52 = arith.negf %43 : vector<8x16xf32>
    %53 = math.exp %52 : vector<8x16xf32>
    %cst_22 = arith.constant 1.000000e+00 : f32
    %54 = vector.broadcast %cst_22 : f32 to vector<8x16xf32>
    %55 = arith.addf %54, %53 : vector<8x16xf32>
    %56 = arith.divf %54, %55 : vector<8x16xf32>
    %57 = arith.mulf %56, %29 : vector<8x16xf32>
    %58 = arith.addf %51, %57 : vector<8x16xf32>
    %59 = arith.negf %44 : vector<8x16xf32>
    %60 = math.exp %59 : vector<8x16xf32>
    %cst_23 = arith.constant 1.000000e+00 : f32
    %61 = vector.broadcast %cst_23 : f32 to vector<8x16xf32>
    %62 = arith.addf %61, %60 : vector<8x16xf32>
    %63 = arith.divf %61, %62 : vector<8x16xf32>
    %64 = math.tanh %58 : vector<8x16xf32>
    %65 = arith.mulf %63, %64 : vector<8x16xf32>
    %66 = tpu.concatenate %65, %58 in 1 : vector<8x16xf32>, vector<8x16xf32> -> vector<8x32xf32>
    %c0_24 = arith.constant 0 : index
    %c0_25 = arith.constant 0 : index
    %67 = vector.load %arg7[%c0_24, %c0_25] : memref<8x32xf32, #tpu.memory_space<vmem>>, vector<8x32xf32>
    tpu.vector_store %arg7[%c0_24, %c0_25], %66 {strides = array<i32>} : memref<8x32xf32, #tpu.memory_space<vmem>>, vector<8x32xf32>,
    %c0_26 = arith.constant 0 : index
    %c0_27 = arith.constant 0 : index
    %c0_28 = arith.constant 0 : index
    %68 = vector.load %arg6[%c0_26, %c0_27, %c0_28] : memref<1x8x32xf32, #tpu.memory_space<vmem>>, vector<1x8x32xf32>
    %69 = vector.shape_cast %68 : vector<1x8x32xf32> to vector<8x32xf32>
    %70 = vector.shape_cast %66 : vector<8x32xf32> to vector<1x8x32xf32>
    tpu.vector_store %arg6[%c0_26, %c0_27, %c0_28], %70 {strides = array<i32>} : memref<1x8x32xf32, #tpu.memory_space<vmem>>, vector<1x8x32xf32>,
    return
  }
  func.func @transform_0(%arg0: i32) -> (i32, i32, i32) {
    %c0_i32 = arith.constant 0 : i32
    %c0_i32_0 = arith.constant 0 : i32
    %c0_i32_1 = arith.constant 0 : i32
    return %arg0, %c0_i32, %c0_i32_0 : i32, i32, i32
  }
  func.func @transform_1(%arg0: i32) -> (i32, i32, i32) {
    %c0_i32 = arith.constant 0 : i32
    %c0_i32_0 = arith.constant 0 : i32
    %c0_i32_1 = arith.constant 0 : i32
    %c0_i32_2 = arith.constant 0 : i32
    return %c0_i32, %c0_i32_0, %c0_i32_1 : i32, i32, i32
  }
  func.func @transform_2(%arg0: i32) -> (i32, i32) {
    %c0_i32 = arith.constant 0 : i32
    %c0_i32_0 = arith.constant 0 : i32
    %c0_i32_1 = arith.constant 0 : i32
    return %c0_i32, %c0_i32_0 : i32, i32
  }
  func.func @transform_3(%arg0: i32) -> (i32, i32) {
    %c0_i32 = arith.constant 0 : i32
    %c0_i32_0 = arith.constant 0 : i32
    %c0_i32_1 = arith.constant 0 : i32
    return %c0_i32, %c0_i32_0 : i32, i32
  }
  func.func @transform_4(%arg0: i32) -> (i32, i32) {
    %c0_i32 = arith.constant 0 : i32
    %c0_i32_0 = arith.constant 0 : i32
    %c0_i32_1 = arith.constant 0 : i32
    return %c0_i32, %c0_i32_0 : i32, i32
  }
  func.func @transform_5(%arg0: i32) -> (i32, i32, i32) {
    %c0_i32 = arith.constant 0 : i32
    %c0_i32_0 = arith.constant 0 : i32
    %c0_i32_1 = arith.constant 0 : i32
    return %arg0, %c0_i32, %c0_i32_0 : i32, i32, i32
  }
}

</mosaic_0001>

<bundles_post_ra>
// kernel: tracker_run.1
= control target key start
LH: loop header
LB: loop body
LE: loop exit
PB: predicated region body
PF: predicated region fallthrough
CT: control target
= control target key end

     0   :  { %10 = vsyncpa [#allocation4], 0  ;;  %s1118_s0 = inlined_call_operand.vmem [shape: f32[4,24,32], index: 0, kind: input, shape index: {}]   ;;  %s1119_s1 = inlined_call_operand.hbm [shape: f32[2,24,32], index: 1, kind: input, shape index: {}]   ;;  %s1120_s2 = inlined_call_operand.vmem [shape: bf16[128,64], index: 2, kind: input, shape index: {}]   ;;  %s1121_s3 = inlined_call_operand.vmem [shape: f32[1,64], index: 3, kind: input, shape index: {}]   ;;  %s1122_s4 = inlined_call_operand.hbm [shape: f32[8,32], index: 4, kind: input, shape index: {}]   ;;  %s1123_s5 = inlined_call_operand.hbm [shape: f32[4,8,32], index: 5, kind: output, shape index: {}]  }
   0x1   :  { %11 = vsyncpa [#allocation7], 0 }
   0x2   :  { %12 = vsyncpa [#allocation5], 0 }
   0x3   :  { %14 = vsyncpa [#allocation5 + $0x1], 0  ;;  %s939_s18 = smov 0   ;;  %s941_s19 = smov 0  }
   0x4   :  { %s943_s20 = smov 0   ;;  %s945_s21 = smov 0  }
   0x5 LB: > { %s960_s22 = sadd.s32 4294967295, %s895_s21   ;;  %s612_s23 = sadd.s32 4294967294, %s895_s21   ;;  %s895_s21 = sphi %s945_s21, %s1130_s21   ;;  %s891_s20 = sphi %s943_s20, %s1129_s20   ;;  %s887_s19 = sphi %s941_s19, %s1128_s19   ;;  %s883_s18 = sphi %s939_s18, %s1127_s18  }
   0x6   : > { %s964_s24 = sadd.s32 1, %s895_s21   ;;  %s137_s25 = sadd.s32 1, %s891_s20 }
   0x7   : > { %s134_s26 = ssub.s32 %s895_s21, %s964_s24  ;;  %p147_p0 = scmp.ne.s32.totalorder %s891_s20, %s887_s19 }
   0x8   : > { %p135_p1 = scmp.eq.s32.totalorder %s134_s26, 0  ;;  %p148_p2 = scmp.eq.s32.totalorder %s960_s22, 3 }
   0x9   : > { %p153_p3 = scmp.ne.s32.totalorder %s887_s19, %s883_s18  ;;  %p154_p4 = scmp.eq.s32.totalorder %s612_s23, 3 }
   0xa   : > { %s975_s27 = scalar_select %p135_p1, %s891_s20, %s137_s25  }
   0xb   : > { %p977_p5 = por %p148_p2, %p147_p0  ;;  %p981_p6 = por %p154_p4, %p153_p3 }
   0xc   : > { %p613_p7 = scmp.ge.s32.totalorder %s895_s21, 1  ;;  %p161_p8 = scmp.lt.s32.totalorder %s895_s21, 5 }
   0xd   : > { %p614_p9 = scmp.ne.s32.totalorder %s960_s22, 0  ;;  %p693_p10 = scmp.eq.s32.totalorder %s960_s22, 0 }
   0xe   : > { %p989_p11 = pnand %p613_p7, %p161_p8  ;;  %s172_s8 = sshll.u32 %s1119_s1, 4  ;;  %s173_s8 = int_to_ptr.hbm [resolvable:$true] %s172_s8 }
   0xf   : > { %s897_s9 = smov [#allocation3]   ;;  %s193_s13 = sshll.u32 %s1122_s4, 4  ;;  %s194_s13 = int_to_ptr.hbm [resolvable:$true] %s193_s13 }
  0x10   : > { %p682_p12 = pneg %p989_p11  ;;  %s174_s10 = sshll.u32 %s897_s9, 4  ;;  %s175_s10 = int_to_ptr.vmem [resolvable:$true] %s174_s10 }
  0x11   : > { %s898_s14 = smov 128   ;;  %s899_s15 = smov 8  }
  0x12   : > { %p683_p13 = pnand %p693_p10, %p682_p12  ;;  %s900_s16 = smov [#allocation6]  }
  0x13   : > { %s195_s17 = sshll.u32 %s900_s16, 4  ;;  %216 = sbr.rel (%p989_p11) target bundleno = 938 (0x3aa), region = 40  ;;  %s196_s17 = int_to_ptr.vmem [resolvable:$true] %s195_s17 }
  0x14   : > { %685 = dma.hbm_to_vmem [thread:$0]  (!%p683_p13), %s173_s8, 768, %s175_s10, [#allocation4], %s898_s14, %s898_s14, %s899_s15  }
  0x15   : > { %688 = dma.hbm_to_vmem [thread:$0]  (!%p683_p13), %s194_s13, 128, %s196_s17, [#allocation7]  }
  0x18   : > { %870 = dma.done.wait (%p693_p10), [#allocation4], 768  }
  0x19   : > { %872 = vsyncadd (%p693_p10), [#allocation4], 4294966528 }
  0x1a   : > { %874 = dma.done.wait (%p693_p10), [#allocation7], 128  }
  0x1b   : > { %876 = vsyncadd (%p693_p10), [#allocation7], 4294967168  ;;  %s247_s23 = sand.u32 1, %s887_s19   ;;  %p250_p0 = scmp.lt.s32.totalorder %s960_s22, 3 }
  0x1c   : > { %s1017_s25 = sshll.u32 %s247_s23, 3 }
  0x1d   : > { %s251_s26 = scalar_select %p250_p0, %s960_s22, 3 }
  0x1e   : > { %s249_s9 = scalar_lea.vmem [#allocation8], %s1017_s25  ;;  %258 = sbr.rel (%p614_p9) target bundleno = 37 (0x25), region = 52 }
  0x1f   : > { %s671_s30 = smul.u32 24, %s251_s26 }
  0x21   : > { %s254_s8 = scalar_lea.vmem %s1118_s0, %s671_s30 }
  0x23   : > { %v259_v0 = vld [vmem:[#allocation6] sm:$0xff]  ;;  %vm260_vm0 = vcmask 261120  }
  0x24   : > { %261 = vst.msk [vmem:[#allocation2] sm:$0xff] %vm260_vm0, %v259_v0 }
  0x25 PF: > { %v263_v1 = vld [vmem:[%s254_s8 + $0x8] sm:$0xff]  ;;  %vm265_vm1 = vcmask 261120   ;;  %v262_v2 = vld [vmem:[%s254_s8] sm:$0xff]  ;;  %v264_v5 = vld [vmem:[%s254_s8 + $0x10] sm:$0xff]  ;;  %v901_v7 = vmov 32.0   ;;  %s902_s12 = smov 96  }
  0x26   : > { %v269_v3 = vsel %vm265_vm1, %v263_v1, 0.0  ;;  %v266_v4 = vsel %vm265_vm1, %v262_v2, 0.0  ;;  %v272_v6 = vsel %vm265_vm1, %v264_v5, 0.0  ;;  %743 = vrcp.f32 %v901_v7  ;;  %v670_v38 = vld [vmem:[%s1120_s2 + $0x38] sm:$0xff]  ;;  %v669_v41 = vld [vmem:[%s1120_s2 + $0x30] sm:$0xff]  ;;  %v668_v47 = vld [vmem:[%s1120_s2 + $0x28] sm:$0xff] }
  0x27   : > { %270 = vadd.xlane.f32.xlu0 %v269_v3  ;;  %267 = vadd.xlane.f32.xlu1 %v266_v4  ;;  %v667_v53 = vld [vmem:[%s1120_s2 + $0x20] sm:$0xff]  ;;  %v666_v57 = vld [vmem:[%s1120_s2 + $0x18] sm:$0xff]  ;;  %v349_v61 = vld [vmem:[#allocation3 + $0x8] sm:$0xff]  ;;  %s903_s7 = smov 32   ;;  %s904_s8 = smov 64   ;;  %vm375_vm9 = vcmask 523264  }
  0x28   : > { %450 = vmatpush.bf16.msra.mxu0 %v670_v38  ;;  %v356_v0 = vld [vmem:[#allocation3 + $0x20] sm:$0xff]  ;;  %v350_v4 = vld [vmem:[#allocation3 + $0x10] sm:$0xff]  ;;  %s905_s10 = smov 16   ;;  %vm377_vm10 = vcmask 785408   ;;  %vm379_vm11 = vcmask 916480   ;;  %s906_s6 = smov 112  }
  0x29   : > { %vm655_vm12 = vmpackc.low %vm379_vm11, %vm379_vm11  ;;  %s528_s15 = sshll.u32 %s249_s9, 4  ;;  %s529_s15 = int_to_ptr.vmem [resolvable:$true] %s528_s15 }
  0x2b   : > { %v361_v37 = vld [vmem:[#allocation2] sm:$0xff] }
  0x2c   : > { %v744_v8 = vpop.eup %743  ;;  %451 = vmatpush.bf16.msra.mxu0 %v669_v41 }
  0x2d   : > { %v276_v9 = vmul.f32 32.0, %v744_v8  ;;  %vm280_vm2 = vweird.f32 %v744_v8 }
  0x2f   : > { %273 = vadd.xlane.f32.xlu0 %v272_v6  ;;  %v277_v10 = vsub.f32 1.0, %v276_v9  ;;  %v357_v6 = vld [vmem:[#allocation3 + $0x28] sm:$0xff] }
  0x30   : > { %452 = vmatpush.bf16.msra.mxu0 %v668_v47 }
  0x31   : > { %v278_v11 = vmul.f32 %v744_v8, %v277_v10 }
  0x33   : > { %v279_v12 = vadd.f32 %v744_v8, %v278_v11 }
  0x34   : > { %453 = vmatpush.bf16.msra.mxu0 %v667_v53 }
  0x35   : > { %v281_v13 = vsel %vm280_vm2, %v744_v8, %v279_v12  ;;  %vm511_vm2 = vcmask 130048  }
  0x38   : > { %454 = vmatpush.bf16.msra.mxu0 %v666_v57 }
  0x9a   : > { %v271_v14 = vpop.xlane.xlu0 %270  ;;  %v268_v18 = vpop.xlane.xlu1 %267 }
  0x9b   : > { %v283_v15 = vmul.f32 %v281_v13, %v271_v14  ;;  %v282_v22 = vmul.f32 %v281_v13, %v268_v18 }
  0x9d   : > { %v1029_v16 = vsub.f32 %v263_v1, %v283_v15  ;;  %v1038_v25 = vsub.f32 %v262_v2, %v282_v22 }
  0x9f   : > { %v289_v17 = vmul.f32 %v1029_v16, %v1029_v16  ;;  %v288_v27 = vmul.f32 %v1038_v25, %v1038_v25 }
  0xa1   : > { %v294_v19 = vsel %vm265_vm1, %v289_v17, 0.0  ;;  %v291_v28 = vsel %vm265_vm1, %v288_v27, 0.0  ;;  %v664_v17 = vld [vmem:[%s1120_s2 + $0x8] sm:$0xff] }
  0xa2   : > { %v274_v20 = vpop.xlane.xlu0 %273  ;;  %295 = vadd.xlane.f32.xlu1 %v294_v19 }
  0xa3   : > { %v284_v21 = vmul.f32 %v281_v13, %v274_v20  ;;  %v663_v20 = vld [vmem:[%s1120_s2] sm:$0xff] }
  0xa5   : > { %v1034_v23 = vsub.f32 %v264_v5, %v284_v21 }
  0xa7   : > { %v290_v24 = vmul.f32 %v1034_v23, %v1034_v23 }
  0xa9   : > { %v297_v26 = vsel %vm265_vm1, %v290_v24, 0.0 }
  0xaa   : > { %298 = vadd.xlane.f32.xlu2 %v297_v26 }
  0xb2   : > { %292 = vadd.xlane.f32.xlu2 %v291_v28  ;;  %v348_v28 = vld [vmem:[#allocation3] sm:$0xff] }
  0xca   : > { %371 = vrot.lane.b32.xlu2 %v361_v37, %s902_s12 }
 0x115   : > { %v296_v29 = vpop.xlane.xlu1 %295 }
 0x116   : > { %v301_v30 = vmul.f32 0.032258064, %v296_v29 }
 0x118   : > { %745 = vrsqrt.f32 %v301_v30  ;;  %vm322_vm3 = vcmp.eq.f32.partialorder %v301_v30, inf  ;;  %v325_v46 = vand.u32 2147483648, %v301_v30  ;;  %vm324_vm4 = vcmp.eq.f32.partialorder %v301_v30, 0.0 }
 0x11d   : > { %v299_v31 = vpop.xlane.xlu2 %298 }
 0x11e   : > { %v746_v32 = vpop.eup %745  ;;  %v302_v33 = vmul.f32 0.032258064, %v299_v31 }
 0x11f   : > { %v316_v34 = vmul.f32 %v746_v32, %v301_v30 }
 0x120   : > { %747 = vrsqrt.f32 %v302_v33  ;;  %vm334_vm5 = vcmp.eq.f32.partialorder %v302_v33, inf  ;;  %v337_v56 = vand.u32 2147483648, %v302_v33  ;;  %vm336_vm6 = vcmp.eq.f32.partialorder %v302_v33, 0.0 }
 0x121   : > { %v317_v35 = vmul.f32 %v746_v32, %v316_v34 }
 0x123   : > { %v318_v36 = vmul.f32 0.5, %v317_v35 }
 0x125   : > { %v319_v39 = vsub.f32 1.5, %v318_v36  ;;  %v293_v9 = vpop.xlane.xlu2 %292 }
 0x126   : > { %v748_v40 = vpop.eup %747  ;;  %v300_v10 = vmul.f32 0.032258064, %v293_v9 }
 0x127   : > { %v328_v42 = vmul.f32 %v748_v40, %v302_v33  ;;  %v320_v43 = vmul.f32 %v746_v32, %v319_v39 }
 0x128   : > { %vm310_vm7 = vcmp.eq.f32.partialorder %v300_v10, inf  ;;  %v313_v21 = vand.u32 2147483648, %v300_v10  ;;  %vm312_vm8 = vcmp.eq.f32.partialorder %v300_v10, 0.0 }
 0x129   : > { %v329_v44 = vmul.f32 %v748_v40, %v328_v42  ;;  %v321_v45 = vmul.f32 %v320_v43, %v301_v30 }
 0x12b   : > { %v323_v48 = vsel %vm322_vm3, %v301_v30, %v321_v45  ;;  %v330_v49 = vmul.f32 0.5, %v329_v44  ;;  %v355_v30 = vld [vmem:[#allocation3 + $0x18] sm:$0xff] }
 0x12c   : > { %v326_v50 = vsel %vm324_vm4, %v325_v46, %v323_v48 }
 0x12d   : > { %v340_v51 = vadd.f32 1e-06, %v326_v50  ;;  %v331_v52 = vsub.f32 1.5, %v330_v49 }
 0x12f   : > { %749 = vrcp.f32 %v340_v51  ;;  %v332_v54 = vmul.f32 %v748_v40, %v331_v52 }
 0x131   : > { %v333_v55 = vmul.f32 %v332_v54, %v302_v33 }
 0x133   : > { %v335_v58 = vsel %vm334_vm5, %v302_v33, %v333_v55  ;;  %v372_v33 = vpop.permute.xlu2 %371 }
 0x134   : > { %v338_v59 = vsel %vm336_vm6, %v337_v56, %v335_v58 }
 0x135   : > { %v750_v60 = vpop.eup %749  ;;  %v341_v62 = vadd.f32 1e-06, %v338_v59 }
 0x136   : > { %v346_v63 = vmul.f32 %v750_v60, %v1029_v16  ;;  %v665_v16 = vld [vmem:[%s1120_s2 + $0x10] sm:$0xff] }
 0x137   : > { %751 = vrcp.f32 %v341_v62  ;;  %455 = vmatpush.bf16.msra.mxu0 %v665_v16 }
 0x138   : > { %v352_v1 = vmul.f32 %v349_v61, %v346_v63  ;;  %753 = vrsqrt.f32 %v300_v10 }
 0x13a   : > { %v359_v2 = vadd.f32 %v356_v0, %v352_v1 }
 0x13b   : > { %456 = vmatpush.bf16.msra.mxu0 %v664_v17 }
 0x13c   : > { %363 = vrot.lane.b32.xlu0 %v359_v2, %s903_s7  ;;  %s907_s7 = smov 48  }
 0x13d   : > { %v752_v3 = vpop.eup %751 }
 0x13e   : > { %v347_v5 = vmul.f32 %v752_v3, %v1034_v23  ;;  %v754_v11 = vpop.eup %753 }
 0x13f   : > { %v304_v12 = vmul.f32 %v754_v11, %v300_v10  ;;  %457 = vmatpush.bf16.msra.mxu0 %v663_v20 }
 0x140   : > { %v353_v7 = vmul.f32 %v350_v4, %v347_v5 }
 0x141   : > { %v305_v13 = vmul.f32 %v754_v11, %v304_v12 }
 0x142   : > { %v360_v8 = vadd.f32 %v357_v6, %v353_v7 }
 0x143   : > { %v306_v14 = vmul.f32 0.5, %v305_v13 }
 0x144   : > { %367 = vrot.lane.b32.xlu1 %v360_v8, %s904_s8  ;;  %488 = vrot.lane.b32.xlu0 %v361_v37, %s905_s10  ;;  %s908_s8 = smov 80  }
 0x145   : > { %v307_v15 = vsub.f32 1.5, %v306_v14 }
 0x147   : > { %v308_v18 = vmul.f32 %v754_v11, %v307_v15 }
 0x149   : > { %v309_v19 = vmul.f32 %v308_v18, %v300_v10 }
 0x14b   : > { %v311_v22 = vsel %vm310_vm7, %v300_v10, %v309_v19 }
 0x14c   : > { %v314_v23 = vsel %vm312_vm8, %v313_v21, %v311_v22 }
 0x14d   : > { %v339_v24 = vadd.f32 1e-06, %v314_v23 }
 0x14f   : > { %755 = vrcp.f32 %v339_v24 }
 0x155   : > { %v756_v26 = vpop.eup %755 }
 0x156   : > { %v345_v27 = vmul.f32 %v756_v26, %v1038_v25  ;;  %v742_v25 = vld [vmem:[%s1121_s3] ss:$0 sm:$0xff] }
 0x158   : > { %v351_v29 = vmul.f32 %v348_v28, %v345_v27 }
 0x15a   : > { %v358_v32 = vadd.f32 %v355_v30, %v351_v29 }
 0x1ae   : > { %v364_v31 = vpop.permute.xlu0 %363 }
 0x1af   : > { %v374_v34 = vsel %vm265_vm1, %v358_v32, %v364_v31 }
 0x1b6   : > { %v368_v35 = vpop.permute.xlu1 %367  ;;  %v489_v52 = vpop.permute.xlu0 %488 }
 0x1b7   : > { %v376_v36 = vsel %vm375_vm9, %v374_v34, %v368_v35 }
 0x1b8   : > { %v378_v37 = vsel %vm377_vm10, %v376_v36, %v372_v33 }
 0x1b9   : > { %v656_v38 = vpack.c.bf16 %v378_v37, %v378_v37 }
 0x1bb   : > { %657 = vmatmul.msk.bf16.vlgmr.msra.gmra.mxu0 %vm655_vm12, %v656_v38 }
 0x238   : > { %v459_v39 = vpop.f32.mrf.mxu0 }
 0x239   : > { %v460_v40 = vadd.f32 %v742_v25, %v459_v39 }
 0x23b   : > { %v658_v41 = vmul.f32 -1.442695, %v460_v40 }
 0x23d   : > { %757 = vpow2.f32 %v658_v41 }
 0x240   : > { %v461_v42 = vpop.f32.mrf.mxu0 }
 0x243   : > { %v758_v43 = vpop.eup %757 }
 0x244   : > { %v467_v44 = vadd.f32 1.0, %v758_v43 }
 0x246   : > { %759 = vrcp.f32 %v467_v44  ;;  %v479_v48 = vand.u32 2147483648, %v467_v44  ;;  %v477_v50 = vand.u32 2147483647, %v467_v44  ;;  %vm473_vm14 = vweird.f32 %v467_v44 }
 0x247   : > { %761 = vtanh.f32 %v460_v40 }
 0x248   : > { %v480_v53 = vor.u32 1.1754944e-38, %v479_v48  ;;  %vm478_vm0 = vcmp.eq.f32.partialorder %v477_v50, 8.507059e+37 }
 0x24c   : > { %v760_v45 = vpop.eup %759 }
 0x24d   : > { %v469_v46 = vmul.f32 %v760_v45, %v467_v44  ;;  %vm474_vm13 = vweird.f32 %v760_v45  ;;  %v762_v58 = vpop.eup %761 }
 0x24e   : > { %vm475_vm15 = vmor %vm473_vm14, %vm474_vm13 }
 0x24f   : > { %v470_v47 = vsub.f32 1.0, %v469_v46 }
 0x251   : > { %v471_v49 = vmul.f32 %v760_v45, %v470_v47 }
 0x253   : > { %v472_v51 = vadd.f32 %v760_v45, %v471_v49 }
 0x255   : > { %v476_v54 = vsel %vm475_vm15, %v760_v45, %v472_v51 }
 0x256   : > { %v481_v55 = vsel %vm478_vm0, %v480_v53, %v476_v54 }
 0x257   : > { %v491_v56 = vmul.f32 %v489_v52, %v481_v55  ;;  %484 = vrot.lane.b32.xlu2 %v481_v55, %s906_s6  ;;  %s845_s6 = scalar_lea.hbm %s1123_s5, 32 }
 0x259   : > { %493 = vrot.lane.b32.xlu1 %v491_v56, %s902_s12  ;;  %s660_s12 = sshll.u32 %s960_s22, 3  ;;  %s516_s22 = scalar_lea.sflag [#allocation5], %s247_s23 }
 0x25a   : > { %s526_s14 = scalar_lea.hbm %s1123_s5, %s660_s12 }
 0x25b   : > { %s530_s16 = sshll.u32 %s526_s14, 4  ;;  %s531_s16 = int_to_ptr.hbm [resolvable:$true] %s530_s16 }
 0x2b1   : > { %v485_v57 = vpop.permute.xlu2 %484 }
 0x2b2   : > { %v487_v59 = vmul.f32 %v762_v58, %v485_v57 }
 0x2cb   : > { %v494_v60 = vpop.permute.xlu1 %493 }
 0x2cc   : > { %v496_v61 = vadd.f32 %v494_v60, %v487_v59 }
 0x2ce   : > { %763 = vtanh.f32 %v496_v61  ;;  %508 = vrot.lane.b32.xlu1 %v496_v61, %s905_s10  ;;  %s839_s10 = sshra.s32 %s531_s16, 4  ;;  %s840_s10 = int_to_ptr.hbm [resolvable:$true] %s839_s10 }
 0x2cf   : > { %s841_s17 = scalar_lea.hbm %s840_s10, 8  ;;  %p846_p4 = scmp.lt.s32.totalorder %s840_s10, %s1123_s5 }
 0x2d0   : > { %p842_p1 = scmp.ne.s32.totalorder %s840_s10, %s841_s17  ;;  %p847_p7 = scmp.lt.s32.totalorder %s845_s6, %s841_s17 }
 0x2d2   : > { %p843_p2 = pnand %p842_p1, %p977_p5  ;;  %p848_p8 = por %p847_p7, %p846_p4 }
 0x2d4   : > { %v764_v62 = vpop.eup %763  ;;  %p844_p3 = pneg %p843_p2 }
 0x2d5   : > { %499 = vrot.lane.b32.xlu0 %v764_v62, %s907_s7 }
 0x2d6   : > { %p849_p9 = pnand %p848_p8, %p844_p3 }
 0x340   : > { %v509_v1 = vpop.permute.xlu1 %508 }
 0x347   : > { %v500_v63 = vpop.permute.xlu0 %499 }
 0x348   : > { %v502_v0 = vmul.f32 %v500_v63, %v481_v55 }
 0x34a   : > { %504 = vrot.lane.b32.xlu2 %v502_v0, %s908_s8 }
 0x3a4   : > { %v505_v2 = vpop.permute.xlu2 %504 }
 0x3a5   : > { %v512_v3 = vsel %vm511_vm2, %v505_v2, %v509_v1 }
 0x3a6   : > { %513 = vst.msk [vmem:[#allocation2] sm:$0xff] %vm265_vm1, %v512_v3 }
 0x3a7   : > { %514 = vst.msk [vmem:[%s249_s9] sm:$0xff] %vm265_vm1, %v512_v3 }
 0x3a8   : > { %852 = shalt.err (!%p849_p9)
}
 0x3a9   : > { %680 = dma.vmem_to_hbm [thread:$0]  (%p977_p5), %s529_s15, 128, %s531_s16, %s516_s22  }
 0x3aa PF: > { %p697_p10 = scmp.ge.s32.totalorder %s895_s21, 2  ;;  %s542_s23 = sand.u32 1, %s883_s18  }
 0x3ab   : > { %s543_s25 = scalar_lea.sflag [#allocation5], %s542_s23 }
 0x3ac   : > { %p690_p11 = pnand %p697_p10, %p981_p6 }
 0x3ae   : > { %p691_p12 = pneg %p690_p11 }
 0x3b0   : > { %878 = dma.done.wait (%p691_p12), %s543_s25, 128  }
 0x3b1   : > { %880 = vsyncadd (%p691_p12), %s543_s25, 4294967168  ;;  %p17_p13 = scmp.ge.s32.totalorder %s964_s24, 6   ;;  %s1127_s18 = smov %s887_s19 }
 0x3b2   : > { %s1128_s19 = smov %s891_s20  ;;  %s1129_s20 = smov %s975_s27 }
 0x3b3   : > { %s1130_s21 = smov %s964_s24  ;;  %19 = sbr.rel (!%p17_p13) target bundleno = 5 (0x5), region = 89 }
 0x3b8   :  { %549 = vsyncpa [#allocation4], 1 }
 0x3b9   :  { %551 = vsyncpa [#allocation4 + $0x1], 1 }
 0x3ba   :  { %552 = vsyncpa [#allocation7], 1 }
 0x3bb   :  { %553 = vsyncpa [#allocation5], 1 }
 0x3bc   :  { %555 = vsyncpa [#allocation5 + $0x1], 1 }

</bundles_post_ra>
